<compile_context>
chip_gen: v6e
topology: v6e:2x2x1
jax: 0.10.0
libtpu: 0.0.40
codegen_flags: <defaults>
</compile_context>

<pallas_src>
import functools

import jax
import jax.numpy as jnp
from jax.experimental import pallas as pl
from jax.experimental.pallas import tpu as pltpu

# ----------------------------- configuration -----------------------------
NLABELS = 1
Z_DIM = 32
NC = 3
NGF = 8
SIZE = 16
FEAT = SIZE // 8  # 2
BN_EPS = 1e-5
OUT_PAD = 128     # lane-dense N for the final conv GEMM

_VMEM = pl.BlockSpec(memory_space=pltpu.MemorySpace.VMEM)

# parity -> {padded-row start : transposed-conv kernel index}
#   even output rows use kh in {1,3}; odd output rows use kh in {0,2}
_TAPS = ({1: 1, 0: 3}, {2: 0, 1: 2})


# ----------------------------- Pallas kernels -----------------------------
def _matmul_bias_kernel(x_ref, w_ref, b_ref, o_ref, *, act):
    """o = act(x @ w + b).  x:(M,K) bf16, w:(K,N) bf16, b:(1,N) f32, o:(M,N) f32."""
    y = jnp.dot(x_ref[...], w_ref[...], preferred_element_type=jnp.float32)
    y = y + b_ref[...]
    if act == "tanh":
        y = jnp.tanh(y)
    elif act == "relu":
        y = jnp.maximum(y, 0.0)
    o_ref[...] = y.astype(o_ref.dtype)


def _deconv_bn_relu_kernel(cols_ref, w_ref, b_ref, fold_ref, sel_ref, g_ref, bt_ref, o_ref):
    """Fused phase-decomposed ConvTranspose2d(4,2,1) + bias + conditional BN + ReLU.

    cols : (M, 9*Cin)   bf16   im2col of the 3x3 shifted input slices (M = B*H*W)
    w    : (9*Cin, 4*Cout) bf16  phase-stacked deconv weights
    b    : (1, 4*Cout)  f32    conv bias tiled over phases
    fold : (4*Cout, 4*Cout) f32  constant that averages the 4 phase column groups
    sel  : (M, B)       f32    one-hot row -> sample selector
    g,bt : (B, 4*Cout)  f32    per-sample BN gamma/beta tiled over phases
    o    : (M, 4*Cout)  f32
    """
    acc = jnp.dot(cols_ref[...], w_ref[...], preferred_element_type=jnp.float32)
    acc = acc + b_ref[...]

    # train-mode batch statistics per channel, pooled over rows and the 4 phase groups
    mean_row = jnp.mean(acc, axis=0, keepdims=True)                         # (1, 4C)
    mean4 = jnp.dot(mean_row, fold_ref[...], preferred_element_type=jnp.float32)
    d = acc - mean4
    var_row = jnp.mean(d * d, axis=0, keepdims=True)                        # biased var
    var4 = jnp.dot(var_row, fold_ref[...], preferred_element_type=jnp.float32)
    xn = d * jax.lax.rsqrt(var4 + BN_EPS)

    # per-sample affine, expanded in VMEM via the one-hot selector (no HBM repeat slabs)
    g_rows = jnp.dot(sel_ref[...], g_ref[...], preferred_element_type=jnp.float32)
    b_rows = jnp.dot(sel_ref[...], bt_ref[...], preferred_element_type=jnp.float32)
    o_ref[...] = jnp.maximum(xn * g_rows + b_rows, 0.0).astype(o_ref.dtype)


# ----------------------------- Pallas call wrappers -----------------------------
def pallas_linear(x, w_bf16, b_f32, act=None):
    M = x.shape[0]
    N = w_bf16.shape[1]
    kernel = functools.partial(_matmul_bias_kernel, act=act)
    return pl.pallas_call(
        kernel,
        out_shape=jax.ShapeDtypeStruct((M, N), jnp.float32),
        in_specs=[_VMEM, _VMEM, _VMEM],
        out_specs=_VMEM,
    )(x.astype(jnp.bfloat16), w_bf16, b_f32)


def pallas_deconv_bn_relu(cols, w_mat, bias4, fold, sel, g4, b4):
    M = cols.shape[0]
    N = w_mat.shape[1]
    return pl.pallas_call(
        _deconv_bn_relu_kernel,
        out_shape=jax.ShapeDtypeStruct((M, N), jnp.float32),
        in_specs=[_VMEM] * 7,
        out_specs=_VMEM,
    )(cols, w_mat, bias4, fold, sel, g4, b4)


# ----------------------------- JAX glue (layout only) -----------------------------
def _shifted_cols(x):
    """x: (B, H, W, Cin) NHWC -> (B*H*W, 9*Cin): the 3x3 shifted slices of the 1-padded x."""
    B, H, W, Cin = x.shape
    xp = jnp.pad(x, ((0, 0), (1, 1), (1, 1), (0, 0)))
    slabs = [xp[:, dh:dh + H, dw:dw + W, :] for dh in range(3) for dw in range(3)]
    cols = jnp.stack(slabs, axis=3)                       # (B, H, W, 9, Cin)
    return cols.reshape(B * H * W, 9 * Cin)


def _pack_deconv_weight(w_ct):
    """PyTorch ConvTranspose2d weight (Cin, Cout, 4, 4) -> phase-stacked (9*Cin, 4*Cout)."""
    Cin, Cout = w_ct.shape[0], w_ct.shape[1]
    wm = jnp.zeros((9, Cin, 4, Cout), w_ct.dtype)
    for ph in (0, 1):
        for pw in (0, 1):
            p = ph * 2 + pw
            for rs, kh in _TAPS[ph].items():
                for cs, kw in _TAPS[pw].items():
                    t = rs * 3 + cs
                    wm = wm.at[t, :, p, :].set(w_ct[:, :, kh, kw])
    return wm.reshape(9 * Cin, 4 * Cout)


def _unstack_phases(y, B, H, W, Cout):
    """(B*H*W, 4*Cout) phase-stacked GEMM output -> NHWC (B, 2H, 2W, Cout)."""
    y = y.reshape(B, H, W, 2, 2, Cout)        # (b, m, n, ph, pw, c)
    y = y.transpose(0, 1, 3, 2, 4, 5)         # (b, m, ph, n, pw, c)
    return y.reshape(B, 2 * H, 2 * W, Cout)


# ----------------------------- parameter init / packing -----------------------------
def init_params(key):
    """Raw parameters in the PyTorch module's layout."""
    ks = jax.random.split(key, 16)
    s = 0.05
    p = {}
    p["fc_w"] = jax.random.normal(ks[0], (Z_DIM, FEAT * FEAT * NGF * 8), jnp.float32) * s
    p["fc_b"] = jax.random.normal(ks[1], (FEAT * FEAT * NGF * 8,), jnp.float32) * s
    p["conv1_w"] = jax.random.normal(ks[2], (NGF * 8, NGF * 4, 4, 4), jnp.float32) * s
    p["conv1_b"] = jax.random.normal(ks[3], (NGF * 4,), jnp.float32) * s
    p["bn1_g"] = 1.0 + 0.1 * jax.random.normal(ks[4], (NLABELS, NGF * 4), jnp.float32)
    p["bn1_b"] = 0.1 * jax.random.normal(ks[5], (NLABELS, NGF * 4), jnp.float32)
    p["conv2_w"] = jax.random.normal(ks[6], (NGF * 4, NGF * 2, 4, 4), jnp.float32) * s
    p["conv2_b"] = jax.random.normal(ks[7], (NGF * 2,), jnp.float32) * s
    p["bn2_g"] = 1.0 + 0.1 * jax.random.normal(ks[8], (NLABELS, NGF * 2), jnp.float32)
    p["bn2_b"] = 0.1 * jax.random.normal(ks[9], (NLABELS, NGF * 2), jnp.float32)
    p["conv3_w"] = jax.random.normal(ks[10], (NGF * 2, NGF, 4, 4), jnp.float32) * s
    p["conv3_b"] = jax.random.normal(ks[11], (NGF,), jnp.float32) * s
    p["bn3_g"] = 1.0 + 0.1 * jax.random.normal(ks[12], (NLABELS, NGF), jnp.float32)
    p["bn3_b"] = 0.1 * jax.random.normal(ks[13], (NLABELS, NGF), jnp.float32)
    p["convo_w"] = jax.random.normal(ks[14], (NC, NGF, 3, 3), jnp.float32) * s
    p["convo_b"] = jax.random.normal(ks[15], (NC,), jnp.float32) * s
    return p


def prepare_params(p):
    """One-time packing into kernel-ready layouts (bf16 GEMM weights, phase stacking, etc.)."""
    q = {}
    q["fc_w"] = p["fc_w"].astype(jnp.bfloat16)
    q["fc_b"] = p["fc_b"].reshape(1, -1).astype(jnp.float32)
    for i, cout in ((1, NGF * 4), (2, NGF * 2), (3, NGF)):
        q[f"conv{i}_w"] = _pack_deconv_weight(p[f"conv{i}_w"]).astype(jnp.bfloat16)
        q[f"conv{i}_b"] = jnp.tile(p[f"conv{i}_b"].reshape(1, -1), (1, 4)).astype(jnp.float32)
        q[f"bn{i}_g"] = p[f"bn{i}_g"].astype(jnp.float32)     # (NLABELS, C)
        q[f"bn{i}_b"] = p[f"bn{i}_b"].astype(jnp.float32)
        q[f"fold{i}"] = jnp.tile(jnp.eye(cout, dtype=jnp.float32), (4, 4)) * 0.25
    # final 3x3 conv: (kh,kw,ci) x co GEMM weight, N padded to 128 lanes
    w_mat = p["convo_w"].transpose(2, 3, 1, 0).reshape(9 * NGF, NC)
    q["convo_w"] = jnp.zeros((9 * NGF, OUT_PAD), jnp.bfloat16).at[:, :NC].set(
        w_mat.astype(jnp.bfloat16))
    q["convo_b"] = jnp.zeros((1, OUT_PAD), jnp.float32).at[:, :NC].set(
        p["convo_b"].reshape(1, NC).astype(jnp.float32))
    return q


# ----------------------------- forward pass -----------------------------
def deconv_bn_relu_block(x, w_mat, bias4, fold, gamma_tab, beta_tab, y):
    """x: NHWC (B,H,W,Cin) -> NHWC (B,2H,2W,Cout) == relu(bn(conv_transpose(x)))."""
    B, H, W, _ = x.shape
    Cout = w_mat.shape[1] // 4
    cols = _shifted_cols(x).astype(jnp.bfloat16)                              # (M, 9*Cin)
    sel = jnp.repeat(jnp.eye(B, dtype=jnp.float32), H * W, axis=0)            # (M, B)
    g4 = jnp.tile(gamma_tab[y], (1, 4)).astype(jnp.float32)                   # (B, 4*Cout)
    b4 = jnp.tile(beta_tab[y], (1, 4)).astype(jnp.float32)
    out = pallas_deconv_bn_relu(cols, w_mat, bias4, fold, sel, g4, b4)        # (M, 4*Cout)
    return _unstack_phases(out, B, H, W, Cout)


def generator_forward(params, z, y):
    B = z.shape[0]
    y = jnp.minimum(y, NLABELS - 1)                   # y.clamp(None, nlabels - 1)
    out = z                                           # unconditional: get_latent = Identity

    # fc -> view(B, ngf*8, fs, fs) -> NHWC
    out = pallas_linear(out, params["fc_w"], params["fc_b"], act=None)
    out = out.reshape(B, NGF * 8, FEAT, FEAT).transpose(0, 2, 3, 1)

    # three fused deconv + conditional-BN + ReLU blocks
    for i in (1, 2, 3):
        out = deconv_bn_relu_block(out, params[f"conv{i}_w"], params[f"conv{i}_b"],
                                   params[f"fold{i}"], params[f"bn{i}_g"],
                                   params[f"bn{i}_b"], y)

    # conv_out: 3x3 conv (lane-padded GEMM) + tanh
    Bx, H, W, _ = out.shape
    cols = _shifted_cols(out).astype(jnp.bfloat16)                            # (B*H*W, 9*ngf)
    img = pallas_linear(cols, params["convo_w"], params["convo_b"], act="tanh")
    img = img[:, :NC].reshape(Bx, H, W, NC).transpose(0, 3, 1, 2)             # back to NCHW
    return img


if __name__ == "__main__":
    key = jax.random.PRNGKey(0)
    k_param, k_z = jax.random.split(key)
    raw = init_params(k_param)
    params = prepare_params(raw)

    B = 2
    z = jax.random.normal(k_z, (B, Z_DIM), jnp.float32)
    y = jnp.zeros((B,), jnp.int32)

    img = generator_forward(params, z, y)
    img = jax.block_until_ready(img)

    assert img.shape == (B, NC, SIZE, SIZE), img.shape
    assert bool(jnp.all(jnp.isfinite(img)))
    assert bool(jnp.all(jnp.abs(img) <= 1.0 + 1e-6))   # tanh range
    print("KERNEL_OK")
</pallas_src>

<mosaic_0001>
module attributes {stable_mosaic.version = 11 : i64} {
  func.func @_matmul_bias_kernel(%arg0: memref<2x32xbf16, #tpu.memory_space<vmem>>, %arg1: memref<32x256xbf16, #tpu.memory_space<vmem>>, %arg2: memref<1x256xf32, #tpu.memory_space<vmem>>, %arg3: memref<2x256xf32, #tpu.memory_space<vmem>>) attributes {dimension_semantics = [], scalar_prefetch = 0 : i64, scratch_operands = 0 : i64, tpu.core_type = #tpu.core_type<tc>} {
    %c0 = arith.constant 0 : index
    %c0_0 = arith.constant 0 : index
    %0 = vector.load %arg0[%c0, %c0_0] : memref<2x32xbf16, #tpu.memory_space<vmem>>, vector<2x32xbf16>
    %c0_1 = arith.constant 0 : index
    %c0_2 = arith.constant 0 : index
    %1 = vector.load %arg1[%c0_1, %c0_2] : memref<32x256xbf16, #tpu.memory_space<vmem>>, vector<32x256xbf16>
    %cst = arith.constant dense<0.000000e+00> : vector<2x256xf32>
    %2 = tpu.matmul %0, %1, %cst {dimension_numbers = #tpu.dot_dimension_numbers<[1], [0], [0], [1], [0, 0, 1, 1], [], []>} : vector<2x32xbf16>, vector<32x256xbf16>, vector<2x256xf32> -> vector<2x256xf32>
    %c0_3 = arith.constant 0 : index
    %c0_4 = arith.constant 0 : index
    %3 = vector.load %arg2[%c0_3, %c0_4] : memref<1x256xf32, #tpu.memory_space<vmem>>, vector<1x256xf32>
    %4 = vector.broadcast %3 : vector<1x256xf32> to vector<2x256xf32>
    %5 = arith.addf %2, %4 : vector<2x256xf32>
    %c0_5 = arith.constant 0 : index
    %c0_6 = arith.constant 0 : index
    %6 = vector.load %arg3[%c0_5, %c0_6] : memref<2x256xf32, #tpu.memory_space<vmem>>, vector<2x256xf32>
    tpu.vector_store %arg3[%c0_5, %c0_6], %5 {strides = array<i32>} : memref<2x256xf32, #tpu.memory_space<vmem>>, vector<2x256xf32>,
    return
  }
}

</mosaic_0001>

<bundles_post_ra>
// kernel: tpu_custom_call.1
= control target key start
LH: loop header
LB: loop body
LE: loop exit
PB: predicated region body
PF: predicated region fallthrough
CT: control target
= control target key end

     0   :  { %8 = vsyncpa [#allocation3], 0  ;;  %s274_s0 = inlined_call_operand.hbm [shape: bf16[2,32], index: 0, kind: input, shape index: {}]   ;;  %s275_s1 = inlined_call_operand.hbm [shape: bf16[32,256], index: 1, kind: input, shape index: {}]   ;;  %s276_s2 = inlined_call_operand.vmem [shape: f32[1,256], index: 2, kind: input, shape index: {}]   ;;  %s277_s3 = inlined_call_operand.hbm [shape: f32[2,256], index: 3, kind: output, shape index: {}]  }
   0x1   :  { %9 = vsyncpa [#allocation6], 0 }
   0x2   :  { %10 = vsyncpa [#allocation4], 0  ;;  %s236_s12 = smov [#allocation2]   ;;  %s237_s14 = smov [#allocation5]  }
   0x3   :  { %s17_s13 = sshll.u32 %s236_s12, 4  ;;  %s26_s15 = sshll.u32 %s237_s14, 4  ;;  %s18_s13 = int_to_ptr.vmem [resolvable:$true] %s17_s13  ;;  %s27_s15 = int_to_ptr.vmem [resolvable:$true] %s26_s15 }
   0x4   :  { %s178_s16 = scalar_lea.vmem %s18_s13, 16  ;;  %s182_s17 = scalar_lea.vmem %s18_s13, 32 }
   0x5   :  { %p179_p0 = scmp.ne.s32.totalorder %s18_s13, %s178_s16  ;;  %p183_p1 = scmp.lt.s32.totalorder %s18_s13, %s18_s13 }
   0x6   :  { %p184_p2 = scmp.lt.s32.totalorder %s182_s17, %s178_s16 }
   0x8   :  { %p185_p3 = por %p184_p2, %p183_p1 }
   0xa   :  { %p186_p4 = pnand %p185_p3, %p179_p0 }
   0xc   :  { %189 = shalt.err (!%p186_p4)
}
   0xd   :  { %20 = dma.hbm_to_vmem [thread:$0]  %s274_s0, 16, %s18_s13, [#allocation3]  }
   0xe   :  { %s198_s20 = scalar_lea.vmem %s27_s15, 512  ;;  %p203_p6 = scmp.lt.s32.totalorder %s27_s15, %s27_s15 }
   0xf   :  { %p199_p5 = scmp.ne.s32.totalorder %s27_s15, %s198_s20  ;;  %p204_p7 = scmp.lt.s32.totalorder %s198_s20, %s198_s20 }
  0x11   :  { %p205_p8 = por %p204_p7, %p203_p6 }
  0x13   :  { %p206_p9 = pnand %p205_p8, %p199_p5 }
  0x15   :  { %209 = shalt.err (!%p206_p9)
}
  0x16   :  { %s238_s21 = smov 128   ;;  %s239_s22 = smov 8  }
  0x17   :  { %32 = dma.hbm_to_vmem [thread:$0]  %s275_s1, 512, %s27_s15, [#allocation6], %s238_s21, %s238_s21, %s239_s22  }
  0x18   :  { %230 = dma.done.wait [#allocation3], 16  }
  0x19   :  { %231 = vsyncadd [#allocation3], 4294967280 }
  0x1a   :  { %232 = dma.done.wait [#allocation6], 512  }
  0x1b   :  { %233 = vsyncadd [#allocation6], 4294966784  ;;  %v240_v0 = vmov 0   ;;  %v164_v1 = vld [vmem:[#allocation5 + $0x14] ss:$8 sps:$4 sm:$0xff]   ;;  %vm79_vm0 = vcmask 261120   ;;  %v49_v6 = vlaneseq }
  0x1c   :  { %115 = vmatprep.mubr.bf16.mxu0 %v240_v0  ;;  %v166_v2 = vld [vmem:[#allocation5 + $0x10] ss:$8 sps:$4 sm:$0xff]   ;;  %95 = vmatprep.subr.bf16.mxu0 %v164_v1  ;;  %v167_v3 = vld [vmem:[#allocation5 + $0x4] ss:$8 sps:$4 sm:$0xff]   ;;  %v169_v4 = vld [vmem:[#allocation5] ss:$8 sps:$4 sm:$0xff]  }
  0x1d   :  { %96 = vmatpush1.bf16.msra.mxu0 %v166_v2  ;;  %v42_v5 = vld [vmem:[#allocation2] sm:$0x1]  ;;  %v50_v7 = vshrl.u32 %v49_v6, 7  ;;  %s241_s25 = smov [#allocation7]  }
  0x1e   :  { %97 = vmatprep.subr.bf16.mxu0 %v167_v3  ;;  %v47_v10 = vld [vmem:[%s276_s2] sm:$0x3]  ;;  %s142_s26 = sshll.u32 %s241_s25, 4  ;;  %s143_s26 = int_to_ptr.vmem [resolvable:$true] %s142_s26 }
  0x1f   :  { %v51_v8 = vsub.s32 0, %v50_v7  ;;  %v55_v9 = vsub.s32 1, %v50_v7  ;;  %s210_s27 = scalar_lea.vmem %s143_s26, 64  ;;  %p215_p11 = scmp.lt.s32.totalorder %s143_s26, %s143_s26 }
  0x20   :  { %p211_p10 = scmp.ne.s32.totalorder %s143_s26, %s210_s27  ;;  %p216_p12 = scmp.lt.s32.totalorder %s210_s27, %s210_s27 }
  0x21   :  { %98 = vmatpush1.bf16.msra.mxu0 %v169_v4  ;;  %v52_v11 = vrot.slane %v47_v10, %v51_v8  ;;  %v56_v12 = vrot.slane %v47_v10, %v55_v9 }
  0x22   :  { %p217_p13 = por %p216_p12, %p215_p11 }
  0x24   :  { %156 = vmatmul.mubr.msk.bf16.vlgmr.msra.gmra.mxu0 %vm79_vm0, %v42_v5  ;;  %p218_p0 = pnand %p217_p13, %p211_p10 }
  0xe4   :  { %v117_v13 = vpop.f32.mrf.mxu0 }
  0xe5   :  { %v118_v15 = vadd.f32 %v117_v13, %v52_v11 }
  0xe6   :  { %v119_v14 = vpop.f32.mrf.mxu0 }
  0xe7   :  { %v120_v16 = vadd.f32 %v119_v14, %v56_v12 }
  0xe8   :  { %v121_v17 = vpop.f32.mrf.mxu0 }
  0xe9   :  { %v126_v18 = vcombine.low %v118_v15, %v120_v16 }
  0xea   :  { %v122_v19 = vpop.f32.mrf.mxu0 }
  0xeb   :  { %157 = vst.sshfl [vmem:[#allocation7] sm:$0x33 pattern:$0x76325410] %v126_v18 }
  0xec   :  { %221 = shalt.err (!%p218_p0)
}
  0xed   :  { %145 = dma.vmem_to_hbm [thread:$0]  %s143_s26, 64, %s277_s3, [#allocation4]  }
  0xee   :  { %234 = dma.done.wait [#allocation4], 64  }
  0xef   :  { %235 = vsyncadd [#allocation4], 4294967232 }
  0xf0   :  { %149 = vsyncpa [#allocation3], 1 }
  0xf1   :  { %150 = vsyncpa [#allocation6], 1 }
  0xf2   :  { %151 = vsyncpa [#allocation4], 1 }

</bundles_post_ra>
